<compile_context>
chip_gen: v7x
topology: tpu7x:2x2x1
jax: 0.10.0
libtpu: 0.0.40
codegen_flags: <defaults>
</compile_context>

<pallas_src>
import functools

import jax
import jax.numpy as jnp
from jax import lax
from jax.experimental import pallas as pl
from jax.experimental.pallas import tpu as pltpu


_COMPILER_PARAMS = pltpu.CompilerParams(
    dimension_semantics=("parallel",),
    vmem_limit_bytes=32 * 1024 * 1024,
)


# ----------------------------------------------------------------------------
# Bilinear 2x upsample (align_corners=True) as two small matmuls per image.
# ----------------------------------------------------------------------------
def _bilinear_kernel(x_ref, ah_ref, awt_ref, o_ref):
    # x_ref: (1, H, W); ah_ref: (Ho, H); awt_ref: (W, Wo); o_ref: (1, Ho, Wo)
    tmp = jnp.dot(ah_ref[...], x_ref[0], preferred_element_type=jnp.float32)
    out = jnp.dot(tmp, awt_ref[...], preferred_element_type=jnp.float32)
    o_ref[0] = out.astype(o_ref.dtype)


def _interp_matrix_align_corners(n_in, n_out, dtype=jnp.float32):
    """Row-stochastic (n_out, n_in) bilinear interpolation matrix, align_corners=True."""
    if n_in == 1:
        return jnp.ones((n_out, 1), dtype)
    src = jnp.arange(n_out, dtype=jnp.float32) * (n_in - 1) / (n_out - 1)
    lo = jnp.clip(jnp.floor(src).astype(jnp.int32), 0, n_in - 1)
    hi = jnp.minimum(lo + 1, n_in - 1)
    frac = src - lo.astype(jnp.float32)
    rows = jnp.arange(n_out)
    a = jnp.zeros((n_out, n_in), jnp.float32)
    a = a.at[rows, lo].add(1.0 - frac)
    a = a.at[rows, hi].add(frac)
    return a.astype(dtype)


def bilinear_upsample_2x(x):
    """x: (N, C, H, W) -> (N, C, 2H, 2W), bilinear, align_corners=True."""
    n, c, h, w = x.shape
    ho, wo = 2 * h, 2 * w
    a_h = _interp_matrix_align_corners(h, ho)        # (Ho, H)
    a_w_t = _interp_matrix_align_corners(w, wo).T    # (W, Wo)
    x_flat = x.reshape(n * c, h, w)                  # contiguous reshape (free)

    out = pl.pallas_call(
        _bilinear_kernel,
        out_shape=jax.ShapeDtypeStruct((n * c, ho, wo), x.dtype),
        grid_spec=pltpu.PrefetchScalarGridSpec(
            num_scalar_prefetch=0,
            grid=(n * c,),
            in_specs=[
                pl.BlockSpec((1, h, w), lambda i: (i, 0, 0)),
                pl.BlockSpec((ho, h), lambda i: (0, 0)),
                pl.BlockSpec((w, wo), lambda i: (0, 0)),
            ],
            out_specs=pl.BlockSpec((1, ho, wo), lambda i: (i, 0, 0)),
        ),
        compiler_params=_COMPILER_PARAMS,
    )(x_flat, a_h, a_w_t)
    return out.reshape(n, c, ho, wo)


# ----------------------------------------------------------------------------
# Fused 3x3 conv (padding=1) + folded BN/bias scale-shift + ReLU.
# ----------------------------------------------------------------------------
def _conv3x3_bn_relu_kernel(xf_ref, w_ref, scale_ref, shift_ref, o_ref, *, h, wq):
    # xf_ref: (1, Cin, (H+3)*Wq) padded+flattened image
    # w_ref:  (3, 3, Cout, Cin)   per-tap weight matrices
    # scale_ref/shift_ref: (Cout, 1)
    # o_ref:  (1, Cout, H*Wq)
    x = xf_ref[0]                                  # (Cin, (H+3)*Wq)
    l_out = h * wq
    acc = jnp.zeros(o_ref.shape[1:], jnp.float32)  # (Cout, H*Wq)
    for ky in range(3):
        for kx in range(3):
            off = ky * wq + kx                     # static flat tap offset
            patch = x[:, off:off + l_out]          # (Cin, H*Wq)
            acc = acc + jnp.dot(w_ref[ky, kx], patch,
                                preferred_element_type=jnp.float32)
    y = acc * scale_ref[...] + shift_ref[...]
    o_ref[0] = jnp.maximum(y, 0.0).astype(o_ref.dtype)


def conv3x3_bn_relu(x, weight, scale, shift):
    """x: (N, Cin, H, W); weight: (Cout, Cin, 3, 3); scale/shift: (Cout,)."""
    n, cin, h, w = x.shape
    cout = weight.shape[0]
    wq = w + 2          # padded row pitch == lane-dense output pitch
    hp = h + 3          # 1 zero row on top, 2 on bottom (keeps tap slices in-bounds)
    l_in = hp * wq
    l_out = h * wq

    # NCHW-native prep: zero-pad spatially, flatten (H, W) into one lane axis.
    xp = jnp.pad(x, ((0, 0), (0, 0), (1, 2), (1, 1)))
    xf = xp.reshape(n, cin, l_in)                       # contiguous reshape (free)
    w_taps = jnp.transpose(weight, (2, 3, 0, 1))        # (3, 3, Cout, Cin) — tiny
    scale2 = scale.reshape(cout, 1).astype(jnp.float32)
    shift2 = shift.reshape(cout, 1).astype(jnp.float32)

    kernel = functools.partial(_conv3x3_bn_relu_kernel, h=h, wq=wq)
    out = pl.pallas_call(
        kernel,
        out_shape=jax.ShapeDtypeStruct((n, cout, l_out), x.dtype),
        grid_spec=pltpu.PrefetchScalarGridSpec(
            num_scalar_prefetch=0,
            grid=(n,),
            in_specs=[
                pl.BlockSpec((1, cin, l_in), lambda i: (i, 0, 0)),
                pl.BlockSpec((3, 3, cout, cin), lambda i: (0, 0, 0, 0)),
                pl.BlockSpec((cout, 1), lambda i: (0, 0)),
                pl.BlockSpec((cout, 1), lambda i: (0, 0)),
            ],
            out_specs=pl.BlockSpec((1, cout, l_out), lambda i: (i, 0, 0)),
        ),
        compiler_params=_COMPILER_PARAMS,
    )(xf, w_taps, scale2, shift2)

    # (N, Cout, H*Wq) -> (N, Cout, H, Wq) -> drop the 2 pad columns.
    return out.reshape(n, cout, h, wq)[:, :, :, :w]


# ----------------------------------------------------------------------------
# Up.forward
# ----------------------------------------------------------------------------
def up_forward(x1, x2, params, eps=1e-5):
    # 1) bilinear 2x upsample of x1 (align_corners=True)
    x1u = bilinear_upsample_2x(x1)
    # 2) pad to x2's spatial size (F.pad ordering: left/right/top/bottom)
    diff_y = x2.shape[2] - x1u.shape[2]
    diff_x = x2.shape[3] - x1u.shape[3]
    x1u = jnp.pad(x1u, ((0, 0), (0, 0),
                        (diff_y // 2, diff_y - diff_y // 2),
                        (diff_x // 2, diff_x - diff_x // 2)))
    # 3) channel concat [x2, x1]
    x = jnp.concatenate([x2, x1u], axis=1)

    # 4) DoubleConv: (conv3x3 -> BN -> ReLU) x 2, with BN+bias folded per channel.
    s1 = params["gamma1"] / jnp.sqrt(params["var1"] + eps)
    t1 = params["beta1"] + (params["b1"] - params["mean1"]) * s1
    h1 = conv3x3_bn_relu(x, params["w1"], s1, t1)

    s2 = params["gamma2"] / jnp.sqrt(params["var2"] + eps)
    t2 = params["beta2"] + (params["b2"] - params["mean2"]) * s2
    return conv3x3_bn_relu(h1, params["w2"], s2, t2)


# ----------------------------------------------------------------------------
# Pure-JAX reference
# ----------------------------------------------------------------------------
def _ref_bilinear_up2(x):
    n, c, h, w = x.shape
    ho, wo = 2 * h, 2 * w
    ys = jnp.arange(ho, dtype=jnp.float32) * (h - 1) / (ho - 1)
    xs = jnp.arange(wo, dtype=jnp.float32) * (w - 1) / (wo - 1)
    y0 = jnp.clip(jnp.floor(ys).astype(jnp.int32), 0, h - 1)
    x0 = jnp.clip(jnp.floor(xs).astype(jnp.int32), 0, w - 1)
    y1 = jnp.minimum(y0 + 1, h - 1)
    x1 = jnp.minimum(x0 + 1, w - 1)
    fy = (ys - y0.astype(jnp.float32))[None, None, :, None]
    fx = (xs - x0.astype(jnp.float32))[None, None, None, :]
    ia = x[:, :, y0][:, :, :, x0]
    ib = x[:, :, y0][:, :, :, x1]
    ic = x[:, :, y1][:, :, :, x0]
    idd = x[:, :, y1][:, :, :, x1]
    top = ia * (1 - fx) + ib * fx
    bot = ic * (1 - fx) + idd * fx
    return top * (1 - fy) + bot * fy


def _ref_conv_bn_relu(x, w, b, gamma, beta, mean, var, eps=1e-5):
    y = lax.conv_general_dilated(
        x, w, window_strides=(1, 1), padding=((1, 1), (1, 1)),
        dimension_numbers=("NCHW", "OIHW", "NCHW"))
    y = y + b[None, :, None, None]
    y = (y - mean[None, :, None, None]) / jnp.sqrt(var[None, :, None, None] + eps)
    y = gamma[None, :, None, None] * y + beta[None, :, None, None]
    return jnp.maximum(y, 0.0)


def _ref_up_forward(x1, x2, p):
    x1u = _ref_bilinear_up2(x1)
    dy = x2.shape[2] - x1u.shape[2]
    dx = x2.shape[3] - x1u.shape[3]
    x1u = jnp.pad(x1u, ((0, 0), (0, 0),
                        (dy // 2, dy - dy // 2), (dx // 2, dx - dx // 2)))
    x = jnp.concatenate([x2, x1u], axis=1)
    h1 = _ref_conv_bn_relu(x, p["w1"], p["b1"], p["gamma1"], p["beta1"],
                           p["mean1"], p["var1"])
    return _ref_conv_bn_relu(h1, p["w2"], p["b2"], p["gamma2"], p["beta2"],
                             p["mean2"], p["var2"])


if __name__ == "__main__":
    key = jax.random.PRNGKey(0)
    keys = jax.random.split(key, 16)

    batch = 2
    in_channels = 4          # channels after concat (x1: 2, x2: 2)
    out_channels = 4
    spatial = 16             # x2 spatial; x1 is spatial // 2 before upsampling

    x1 = jax.random.normal(keys[0], (batch, in_channels // 2, spatial // 2, spatial // 2), jnp.float32)
    x2 = jax.random.normal(keys[1], (batch, in_channels // 2, spatial, spatial), jnp.float32)

    params = {
        "w1": jax.random.normal(keys[2], (out_channels, in_channels, 3, 3), jnp.float32) * 0.1,
        "b1": jax.random.normal(keys[3], (out_channels,), jnp.float32) * 0.1,
        "gamma1": 1.0 + 0.1 * jax.random.normal(keys[4], (out_channels,), jnp.float32),
        "beta1": 0.1 * jax.random.normal(keys[5], (out_channels,), jnp.float32),
        "mean1": 0.1 * jax.random.normal(keys[6], (out_channels,), jnp.float32),
        "var1": jax.random.uniform(keys[7], (out_channels,), jnp.float32, 0.5, 1.5),
        "w2": jax.random.normal(keys[8], (out_channels, out_channels, 3, 3), jnp.float32) * 0.1,
        "b2": jax.random.normal(keys[9], (out_channels,), jnp.float32) * 0.1,
        "gamma2": 1.0 + 0.1 * jax.random.normal(keys[10], (out_channels,), jnp.float32),
        "beta2": 0.1 * jax.random.normal(keys[11], (out_channels,), jnp.float32),
        "mean2": 0.1 * jax.random.normal(keys[12], (out_channels,), jnp.float32),
        "var2": jax.random.uniform(keys[13], (out_channels,), jnp.float32, 0.5, 1.5),
    }

    y = up_forward(x1, x2, params)
    y = jax.block_until_ready(y)

    y_ref = _ref_up_forward(x1, x2, params)
    assert y.shape == (batch, out_channels, spatial, spatial), y.shape
    assert jnp.allclose(y, y_ref, atol=1e-4, rtol=1e-4), float(jnp.max(jnp.abs(y - y_ref)))

    print("KERNEL_OK")
</pallas_src>

<mosaic_0001>
module attributes {stable_mosaic.version = 11 : i64} {
  func.func @_bilinear_kernel(%arg0: i32, %arg1: memref<1x8x8xf32, #tpu.memory_space<vmem>>, %arg2: memref<16x8xf32, #tpu.memory_space<vmem>>, %arg3: memref<8x16xf32, #tpu.memory_space<vmem>>, %arg4: memref<1x16x16xf32, #tpu.memory_space<vmem>>) attributes {dimension_semantics = [#tpu.dimension_semantics<parallel>], iteration_bounds = array<i64: 4>, scalar_prefetch = 0 : i64, scratch_operands = 0 : i64, tpu.core_type = #tpu.core_type<tc>, window_params = [{transform_indices = @transform_0, window_bounds = array<i64: 1, 8, 8>}, {pipeline_mode = #tpu.pipeline_mode<synchronous>, transform_indices = @transform_1, window_bounds = array<i64: 16, 8>}, {pipeline_mode = #tpu.pipeline_mode<synchronous>, transform_indices = @transform_2, window_bounds = array<i64: 8, 16>}, {transform_indices = @transform_3, window_bounds = array<i64: 1, 16, 16>}]} {
    %c0 = arith.constant 0 : index
    %c0_0 = arith.constant 0 : index
    %0 = vector.load %arg2[%c0, %c0_0] : memref<16x8xf32, #tpu.memory_space<vmem>>, vector<16x8xf32>
    %c0_1 = arith.constant 0 : index
    %c0_2 = arith.constant 0 : index
    %c0_3 = arith.constant 0 : index
    %1 = vector.load %arg1[%c0_1, %c0_2, %c0_3] : memref<1x8x8xf32, #tpu.memory_space<vmem>>, vector<1x8x8xf32>
    %2 = vector.shape_cast %1 : vector<1x8x8xf32> to vector<8x8xf32>
    %cst = arith.constant dense<0.000000e+00> : vector<16x8xf32>
    %3 = tpu.matmul %0, %2, %cst {dimension_numbers = #tpu.dot_dimension_numbers<[1], [0], [0], [1], [0, 0, 1, 1], [], []>} : vector<16x8xf32>, vector<8x8xf32>, vector<16x8xf32> -> vector<16x8xf32>
    %c0_4 = arith.constant 0 : index
    %c0_5 = arith.constant 0 : index
    %4 = vector.load %arg3[%c0_4, %c0_5] : memref<8x16xf32, #tpu.memory_space<vmem>>, vector<8x16xf32>
    %cst_6 = arith.constant dense<0.000000e+00> : vector<16x16xf32>
    %5 = tpu.matmul %3, %4, %cst_6 {dimension_numbers = #tpu.dot_dimension_numbers<[1], [0], [0], [1], [0, 0, 1, 1], [], []>} : vector<16x8xf32>, vector<8x16xf32>, vector<16x16xf32> -> vector<16x16xf32>
    %c0_7 = arith.constant 0 : index
    %c0_8 = arith.constant 0 : index
    %c0_9 = arith.constant 0 : index
    %6 = vector.load %arg4[%c0_7, %c0_8, %c0_9] : memref<1x16x16xf32, #tpu.memory_space<vmem>>, vector<1x16x16xf32>
    %7 = vector.shape_cast %6 : vector<1x16x16xf32> to vector<16x16xf32>
    %8 = vector.shape_cast %5 : vector<16x16xf32> to vector<1x16x16xf32>
    tpu.vector_store %arg4[%c0_7, %c0_8, %c0_9], %8 {strides = array<i32>} : memref<1x16x16xf32, #tpu.memory_space<vmem>>, vector<1x16x16xf32>,
    return
  }
  func.func @transform_0(%arg0: i32) -> (i32, i32, i32) {
    %c0_i32 = arith.constant 0 : i32
    %c0_i32_0 = arith.constant 0 : i32
    %c0_i32_1 = arith.constant 0 : i32
    return %arg0, %c0_i32, %c0_i32_0 : i32, i32, i32
  }
  func.func @transform_1(%arg0: i32) -> (i32, i32) {
    %c0_i32 = arith.constant 0 : i32
    %c0_i32_0 = arith.constant 0 : i32
    %c0_i32_1 = arith.constant 0 : i32
    return %c0_i32, %c0_i32_0 : i32, i32
  }
  func.func @transform_2(%arg0: i32) -> (i32, i32) {
    %c0_i32 = arith.constant 0 : i32
    %c0_i32_0 = arith.constant 0 : i32
    %c0_i32_1 = arith.constant 0 : i32
    return %c0_i32, %c0_i32_0 : i32, i32
  }
  func.func @transform_3(%arg0: i32) -> (i32, i32, i32) {
    %c0_i32 = arith.constant 0 : i32
    %c0_i32_0 = arith.constant 0 : i32
    %c0_i32_1 = arith.constant 0 : i32
    return %arg0, %c0_i32, %c0_i32_0 : i32, i32, i32
  }
}

</mosaic_0001>

<bundles_post_ra>
// kernel: tpu_custom_call.1
= control target key start
LH: loop header
LB: loop body
LE: loop exit
PB: predicated region body
PF: predicated region fallthrough
CT: control target
= control target key end

     0   :  { %8 = vsyncpa [#allocation3], 0  ;;  %s818_s0 = inlined_call_operand.hbm [shape: f32[4,8,8], index: 0, kind: input, shape index: {}]   ;;  %s819_s1 = inlined_call_operand.vmem [shape: f32[16,8], index: 1, kind: input, shape index: {}]   ;;  %s820_s2 = inlined_call_operand.vmem [shape: f32[8,16], index: 2, kind: input, shape index: {}]   ;;  %s821_s3 = inlined_call_operand.hbm [shape: f32[4,16,16], index: 3, kind: output, shape index: {}]  }
   0x1   :  { %10 = vsyncpa [#allocation3 + $0x1], 0 }
   0x2   :  { %11 = vsyncpa [#allocation4], 0 }
   0x3   :  { %13 = vsyncpa [#allocation4 + $0x1], 0  ;;  %s647_s12 = smov 0   ;;  %s649_s13 = smov 0  }
   0x4   :  { %s651_s14 = smov 0   ;;  %s653_s15 = smov 0  }
   0x5 LB: > { %s668_s16 = sadd.s32 4294967295, %s621_s15   ;;  %s443_s17 = sadd.s32 4294967294, %s621_s15   ;;  %s621_s15 = sphi %s653_s15, %s835_s15   ;;  %s617_s14 = sphi %s651_s14, %s834_s14   ;;  %s613_s13 = sphi %s649_s13, %s833_s13   ;;  %s609_s12 = sphi %s647_s12, %s832_s12  }
   0x6   : > { %s672_s18 = sadd.s32 1, %s621_s15   ;;  %s26_s19 = sadd.s32 1, %s617_s14 }
   0x7   : > { %s23_s20 = ssub.s32 %s621_s15, %s672_s18  ;;  %p33_p0 = scmp.ne.s32.totalorder %s617_s14, %s613_s13 }
   0x8   : > { %p24_p1 = scmp.eq.s32.totalorder %s23_s20, 0  ;;  %p34_p2 = scmp.eq.s32.totalorder %s621_s15, 0 }
   0x9   : > { %p39_p3 = scmp.ne.s32.totalorder %s613_s13, %s609_s12  ;;  %p40_p4 = scmp.eq.s32.totalorder %s668_s16, 0 }
   0xa   : > { %s684_s21 = scalar_select %p24_p1, %s617_s14, %s26_s19  }
   0xb   : > { %p686_p5 = por %p34_p2, %p33_p0  ;;  %p690_p6 = por %p40_p4, %p39_p3 }
   0xc   : > { %p105_p7 = scmp.eq.s32.totalorder %s668_s16, 3  ;;  %p111_p8 = scmp.eq.s32.totalorder %s443_s17, 3 }
   0xd   : > { %p489_p9 = scmp.lt.s32.totalorder %s621_s15, 4  ;;  %s137_s26 = sand.u32 1, %s617_s14  }
   0xe   : > { %p696_p10 = por %p105_p7, %p33_p0  ;;  %p700_p11 = por %p111_p8, %p39_p3 }
   0xf   : > { %s447_s27 = sshll.u32 %s621_s15, 7  ;;  %s446_s28 = sshll.u32 %s137_s26, 3 }
  0x10   : > { %s825_s24 = scalar_select %p696_p10, 1, 0 }
  0x11   : > { %s826_s25 = scalar_select %p700_p11, 1, 0 }
  0x12   : > { %s709_s4 = scalar_lea.hbm %s818_s0, %s447_s27  ;;  %s141_s5 = scalar_lea.vmem [#allocation2], %s446_s28 }
  0x13   : > { %s148_s6 = sshll.u32 %s141_s5, 4  ;;  %p713_p12 = pnand %p489_p9, %p686_p5  ;;  %s717_s6 = int_to_ptr.vmem [resolvable:$true] %s148_s6 }
  0x14   : > { %s138_s8 = scalar_lea.sflag [#allocation3], %s137_s26  ;;  %s525_s9 = scalar_lea.hbm %s709_s4, 128 }
  0x15   : > { %p526_p1 = scmp.ne.s32.totalorder %s709_s4, %s525_s9  ;;  %p527_p2 = pneg %p713_p12 }
  0x16   : > { %s530_s17 = scalar_lea.hbm %s818_s0, 512  ;;  %p531_p5 = scmp.lt.u32.totalorder %s709_s4, %s818_s0 }
  0x17   : > { %p528_p3 = pnand %p527_p2, %p526_p1  ;;  %p532_p7 = scmp.lt.u32.totalorder %s530_s17, %s525_s9 }
  0x18   : > { %p534_p9 = scmp.lt.u32.totalorder %s525_s9, %s709_s4 }
  0x19   : > { %p529_p4 = pneg %p528_p3  ;;  %p533_p8 = por %p532_p7, %p531_p5 }
  0x1b   : > { %p535_p13 = por %p534_p9, %p533_p8 }
  0x1d   : > { %p536_p0 = pnand %p535_p13, %p529_p4 }
  0x1f   : > { %539 = shalt.err (!%p536_p0)
}
  0x20   : > { %s540_s22 = scalar_lea.vmem %s717_s6, 128  ;;  %s623_s26 = smov [#allocation2]  }
  0x21   : > { %p541_p1 = scmp.ne.s32.totalorder %s717_s6, %s540_s22  ;;  %s545_s27 = sshll.u32 %s623_s26, 4  ;;  %s546_s27 = int_to_ptr.vmem [resolvable:$false] %s545_s27 }
  0x22   : > { %s547_s28 = scalar_lea.vmem %s546_s27, 256  ;;  %p548_p10 = scmp.lt.s32.totalorder %s717_s6, %s546_s27 }
  0x23   : > { %p543_p3 = pnand %p541_p1, %p527_p2  ;;  %p549_p5 = scmp.lt.s32.totalorder %s547_s28, %s540_s22 }
  0x25   : > { %p544_p11 = pneg %p543_p3  ;;  %p550_p7 = por %p549_p5, %p548_p10 }
  0x27   : > { %p551_p8 = pnand %p550_p7, %p544_p11 }
  0x29   : > { %554 = shalt.err (!%p551_p8)
}
  0x2a   : > { %484 = dma.hbm_to_vmem [thread:$0]  (!%p713_p12), %s709_s4, 128, %s717_s6, %s138_s8  }
  0x2b   : > { %p828_p13 = scmp.lt.s32.totalorder %s621_s15, 5  ;;  %p829_p0 = scmp.ge.s32.totalorder %s621_s15, 1 }
  0x2d   : > { %p154_p2 = pnand %p829_p0, %p828_p13 }
  0x2e   : > { %s751_s29 = sand.u32 (!%p154_p2), 1, %s613_s13  }
  0x2f   : > { %157 = sbr.rel (%p154_p2) target bundleno = 500 (0x1f4), region = 32  ;;  %s449_s30 = sshll.u32 (!%p154_p2), %s751_s29, 3 }
  0x30   : > { %s160_s5 = scalar_lea.sflag (!%p154_p2), [#allocation3], %s751_s29  ;;  %s163_s9 = scalar_lea.vmem (!%p154_p2), [#allocation2], %s449_s30 }
  0x36   : > { %600 = dma.done.wait (%p690_p6), %s160_s5, 128  }
  0x37   : > { %602 = vsyncadd (%p690_p6), %s160_s5, 4294967168  ;;  %vm189_vm0 = vcmask 64512   ;;  %v188_v0 = vld [vmem:[%s163_s9] sm:$0xff]  ;;  %s450_s23 = sshll.u32 %s751_s29, 4  ;;  %s460_s20 = sshll.u32 %s668_s16, 8  ;;  %vm353_vm1 = vcmask 130048  }
  0x38   : > { %v186_v1 = vld [vmem:[%s819_s1] sm:$0xff]  ;;  %v187_v2 = vld [vmem:[%s819_s1 + $0x8] sm:$0xff]  ;;  %467 = vmatprep.subr.mxu0 %v188_v0  ;;  %s185_s17 = scalar_lea.vmem [#allocation5], %s450_s23  ;;  %s775_s27 = scalar_lea.hbm %s821_s3, %s460_s20 }
  0x39   : > { %469 = vmatprep.mubr.msk.f32.mxu0 %vm189_vm0, %v186_v1  ;;  %468 = vmatpush3.msra.mxu0 %v188_v0  ;;  %v271_v3 = vld [vmem:[%s820_s2] sm:$0xff]  ;;  %s370_s19 = sshll.u32 %s185_s17, 4  ;;  %s357_s28 = scalar_lea.sflag [#allocation4], %s751_s29  ;;  %s770_s19 = int_to_ptr.vmem [resolvable:$true] %s370_s19 }
  0x3a   : > { %470 = vmatmul.mubr.msk.f32.vlgmr.msra.gmra.mrb[0].mxu0 %vm189_vm0, %v187_v2  ;;  %472 = vmatprep.subr.mxu1 %v271_v3  ;;  %s555_s30 = scalar_lea.vmem %s770_s19, 256  ;;  %p830_p10 = scmp.ne.s32.totalorder %s825_s24, 0 }
  0x3b   : > { %473 = vmatpush3.msra.mxu1 %v271_v3  ;;  %p556_p6 = scmp.ne.s32.totalorder %s770_s19, %s555_s30  ;;  %s624_s16 = smov [#allocation5]  }
  0x3c   : > { %s559_s5 = sshll.u32 %s624_s16, 4  ;;  %s560_s5 = int_to_ptr.vmem [resolvable:$false] %s559_s5 }
  0x3d   : > { %p557_p11 = pnand %p556_p6, %p830_p10  ;;  %s561_s9 = scalar_lea.vmem %s560_s5, 512 }
  0x3e   : > { %p562_p4 = scmp.lt.s32.totalorder %s770_s19, %s560_s5  ;;  %p563_p9 = scmp.lt.s32.totalorder %s561_s9, %s555_s30 }
  0x3f   : > { %p558_p12 = pneg %p557_p11 }
  0x40   : > { %p564_p1 = por %p563_p9, %p562_p4 }
  0x42   : > { %p565_p3 = pnand %p564_p1, %p558_p12 }
 0x10d   : > { %v471_v4 = vpop.f32.mrb[0].mxu0 }
 0x10e   : > { %v262_v5 = vpop.f32.mrb[1].mxu0 }
 0x10f   : > { %474 = vmatprep.mubr.msk.f32.mxu1 %vm189_vm0, %v262_v5 }
 0x110   : > { %475 = vmatmul.mubr.msk.f32.vlgmr.msra.gmra.mrb[0].mxu1 %vm189_vm0, %v471_v4 }
 0x1e3   : > { %v476_v6 = vpop.f32.mrb[0].mxu1 }
 0x1e4   : > { %355 = vst.msk [vmem:[%s185_s17 + $0x8] sm:$0xff] %vm353_vm1, %v476_v6  ;;  %v344_v7 = vpop.f32.mrb[1].mxu1 }
 0x1e5   : > { %354 = vst.msk [vmem:[%s185_s17] sm:$0xff] %vm353_vm1, %v344_v7 }
 0x1e6   : > { %568 = shalt.err (!%p565_p3)
}
 0x1e7   : > { %s569_s4 = scalar_lea.hbm %s775_s27, 256  ;;  %s573_s8 = scalar_lea.hbm %s821_s3, 1024 }
 0x1e8   : > { %p570_p5 = scmp.ne.s32.totalorder %s775_s27, %s569_s4  ;;  %p574_p13 = scmp.lt.u32.totalorder %s775_s27, %s821_s3 }
 0x1e9   : > { %p575_p0 = scmp.lt.u32.totalorder %s573_s8, %s569_s4  ;;  %p577_p6 = scmp.lt.u32.totalorder %s569_s4, %s775_s27 }
 0x1ea   : > { %p571_p7 = pnand %p570_p5, %p830_p10 }
 0x1eb   : > { %p576_p2 = por %p575_p0, %p574_p13 }
 0x1ec   : > { %p572_p8 = pneg %p571_p7 }
 0x1ed   : > { %p578_p11 = por %p577_p6, %p576_p2 }
 0x1ef   : > { %p579_p12 = pnand %p578_p11, %p572_p8 }
 0x1f1   : > { %582 = shalt.err (!%p579_p12)
}
 0x1f2   : > { %s625_s23 = smov 128   ;;  %s626_s17 = smov 8  }
 0x1f3   : > { %479 = dma.vmem_to_hbm [thread:$0]  (%p830_p10), %s770_s19, 256, %s775_s27, %s357_s28, %s625_s23, %s625_s23, %s626_s17  }
 0x1f4 PF: > { %p490_p4 = scmp.ge.s32.totalorder %s621_s15, 2  ;;  %s385_s20 = sand.u32 1, %s609_s12  }
 0x1f5   : > { %p831_p9 = scmp.ne.s32.totalorder %s826_s25, 0  ;;  %s386_s22 = scalar_lea.sflag [#allocation4], %s385_s20 }
 0x1f7   : > { %p486_p1 = pnand %p490_p4, %p831_p9 }
 0x1f9   : > { %604 = dma.done.wait (!%p486_p1), %s386_s22, 256  }
 0x1fa   : > { %606 = vsyncadd (!%p486_p1), %s386_s22, 4294967040  ;;  %p16_p3 = scmp.ge.s32.totalorder %s672_s18, 6   ;;  %s832_s12 = smov %s613_s13 }
 0x1fb   : > { %s833_s13 = smov %s617_s14  ;;  %s834_s14 = smov %s684_s21 }
 0x1fc   : > { %s835_s15 = smov %s672_s18  ;;  %18 = sbr.rel (!%p16_p3) target bundleno = 5 (0x5), region = 77 }
 0x203   :  { %391 = vsyncpa [#allocation3], 1 }
 0x204   :  { %393 = vsyncpa [#allocation3 + $0x1], 1 }
 0x205   :  { %394 = vsyncpa [#allocation4], 1 }
 0x206   :  { %396 = vsyncpa [#allocation4 + $0x1], 1 }

</bundles_post_ra>
